<compile_context>
chip_gen: v7x
topology: tpu7x:2x2x1
jax: 0.10.0
libtpu: 0.0.40
codegen_flags: <defaults>
</compile_context>

<pallas_src>
import math

import jax
import jax.numpy as jnp
from jax.experimental import pallas as pl
from jax.experimental.pallas import tpu as pltpu


def vega_kernel(x_ref, w1_ref, bw_ref, b2_ref, o_ref):
    # x_ref : [TB, F] f32   batch tile, read straight from HBM
    # w1_ref: [F, H]  f32   resident
    # bw_ref: [2, H]  f32   resident; row 0 = b1, row 1 = w2
    # b2_ref: [1, 1]  f32   SMEM scalar
    # o_ref : [1, TB] f32   lane-dense output row
    x = x_ref[...]
    bw = bw_ref[...]
    b1 = bw[0:1, :]                                   # [1, H]
    w2r = bw[1:2, :]                                  # [1, H]

    # Layer 1 on the MXU, f32 accumulation. Dropout(p=0.2) == identity at eval.
    h = jnp.dot(x, w1_ref[...], preferred_element_type=jnp.float32)   # [TB, H]
    h = jnp.maximum(h + b1, 0.0)                                      # bias + ReLU

    # Layer 2 as an NT matmul contracting over H: (1,H) x (TB,H) -> (1,TB).
    # Keeps the batch dimension on lanes so the store below is dense.
    z = jax.lax.dot_general(w2r, h, (((1,), (1,)), ((), ())),
                            preferred_element_type=jnp.float32)       # [1, TB]
    z = z + b2_ref[0, 0]

    # Exact sigmoid (exp on the EUP; divide cost is hidden under the DMA).
    o_ref[...] = 1.0 / (1.0 + jnp.exp(-z))


def vega_forward(x, w1, b1, w2, b2, *, tb=8192):
    """x: [B, F] f32. Returns [B, 1] f32 sigmoid probabilities."""
    B, F = x.shape
    H = w1.shape[1]

    x_f = x.astype(jnp.float32)
    w1_f = w1.astype(jnp.float32)
    # Merge the two tiny per-hidden-unit vectors into one resident operand.
    bw = jnp.concatenate([jnp.reshape(b1, (1, H)),
                          jnp.reshape(w2, (1, H))], axis=0).astype(jnp.float32)
    b2_s = jnp.asarray(b2, jnp.float32).reshape(1, 1)

    # Tile selection: one full-batch tile for small B; otherwise a large tile
    # that is a multiple of 128 so the lane-dense output block stays aligned.
    if B <= tb:
        TB, num_tiles = B, 1
    else:
        TB = max(128, (min(tb, B) // 128) * 128)
        num_tiles = pl.cdiv(B, TB)
    Bp = num_tiles * TB          # no jnp.pad: Pallas masks the ragged last tile

    cost = pl.CostEstimate(
        flops=int(2 * Bp * F * H + 2 * Bp * H + 4 * Bp),
        transcendentals=int(2 * Bp),
        bytes_accessed=int(Bp * F * 4 + F * H * 4 + 2 * H * 4 + 4 + Bp * 4),
    )

    out = pl.pallas_call(
        vega_kernel,
        out_shape=jax.ShapeDtypeStruct((1, Bp), jnp.float32),
        grid=(num_tiles,),
        in_specs=[
            pl.BlockSpec((TB, F), lambda i: (i, 0)),              # x: batch-tiled
            pl.BlockSpec((F, H), lambda i: (0, 0)),               # w1: resident
            pl.BlockSpec((2, H), lambda i: (0, 0)),               # [b1; w2]: resident
            pl.BlockSpec((1, 1), lambda i: (0, 0),
                         memory_space=pltpu.MemorySpace.SMEM),    # b2: SMEM scalar
        ],
        out_specs=pl.BlockSpec((1, TB), lambda i: (0, i)),        # lane-dense row
        compiler_params=pltpu.CompilerParams(
            dimension_semantics=("parallel",),
            vmem_limit_bytes=48 * 1024 * 1024,
        ),
        cost_estimate=cost,
    )(x_f, w1_f, bw, b2_s)

    return out[0, :B].reshape(B, 1)


def init_params(key, input_size, hidden_size=10):
    """Deterministic init mimicking torch.nn.Linear default (U[-1/sqrt(fan_in), 1/sqrt(fan_in)])."""
    k1, k2, k3, k4 = jax.random.split(key, 4)
    bound1 = 1.0 / math.sqrt(input_size)
    bound2 = 1.0 / math.sqrt(hidden_size)
    w1 = jax.random.uniform(k1, (input_size, hidden_size), jnp.float32, -bound1, bound1)
    b1 = jax.random.uniform(k2, (1, hidden_size), jnp.float32, -bound1, bound1)
    w2 = jax.random.uniform(k3, (hidden_size, 1), jnp.float32, -bound2, bound2)
    b2 = jax.random.uniform(k4, (1, 1), jnp.float32, -bound2, bound2)
    return w1, b1, w2, b2


if __name__ == "__main__":
    key = jax.random.PRNGKey(0)
    kx1, kx2, kp = jax.random.split(key, 3)

    F = 23  # credit-card-default dataset has 23 feature columns
    w1, b1, w2, b2 = init_params(kp, F)

    def reference(xx):
        h = jnp.maximum(xx @ w1 + b1, 0.0)
        return 1.0 / (1.0 + jnp.exp(-(h @ w2 + b2)))

    # Case 1: tiny batch -> single full-batch tile, grid=(1,).
    x_small = jax.random.normal(kx1, (40, F), dtype=jnp.float32)
    out_small = vega_forward(x_small, w1, b1, w2, b2)
    jax.block_until_ready(out_small)
    assert out_small.shape == (40, 1)
    assert jnp.allclose(out_small, reference(x_small), atol=2e-3), "small-batch mismatch"

    # Case 2: multi-tile ragged batch (B=300, TB=128 -> grid=(3,), masked tail rows).
    x_big = jax.random.normal(kx2, (300, F), dtype=jnp.float32)
    out_big = vega_forward(x_big, w1, b1, w2, b2, tb=128)
    jax.block_until_ready(out_big)
    assert out_big.shape == (300, 1)
    assert jnp.allclose(out_big, reference(x_big), atol=2e-3), "ragged multi-tile mismatch"

    print("KERNEL_OK")
</pallas_src>

<mosaic_0001>
module attributes {stable_mosaic.version = 11 : i64} {
  func.func @vega_kernel(%arg0: i32, %arg1: memref<40x23xf32, #tpu.memory_space<vmem>>, %arg2: memref<23x10xf32, #tpu.memory_space<vmem>>, %arg3: memref<2x10xf32, #tpu.memory_space<vmem>>, %arg4: memref<1x1xf32, #tpu.memory_space<smem>>, %arg5: memref<1x40xf32, #tpu.memory_space<vmem>>) attributes {dimension_semantics = [#tpu.dimension_semantics<parallel>], iteration_bounds = array<i64: 1>, scalar_prefetch = 0 : i64, scratch_operands = 0 : i64, tpu.core_type = #tpu.core_type<tc>, window_params = [{transform_indices = @transform_0, window_bounds = array<i64: 40, 23>}, {pipeline_mode = #tpu.pipeline_mode<synchronous>, transform_indices = @transform_1, window_bounds = array<i64: 23, 10>}, {pipeline_mode = #tpu.pipeline_mode<synchronous>, transform_indices = @transform_2, window_bounds = array<i64: 2, 10>}, {transform_indices = @transform_3, window_bounds = array<i64: 1, 1>}, {transform_indices = @transform_4, window_bounds = array<i64: 1, 40>}]} {
    %c0 = arith.constant 0 : index
    %c0_0 = arith.constant 0 : index
    %0 = vector.load %arg1[%c0, %c0_0] : memref<40x23xf32, #tpu.memory_space<vmem>>, vector<40x23xf32>
    %c0_1 = arith.constant 0 : index
    %c0_2 = arith.constant 0 : index
    %1 = vector.load %arg3[%c0_1, %c0_2] : memref<2x10xf32, #tpu.memory_space<vmem>>, vector<2x10xf32>
    %2 = vector.extract_strided_slice %1 {offsets = [0, 0], sizes = [1, 10], strides = [1, 1]} : vector<2x10xf32> to vector<1x10xf32>
    %3 = vector.extract_strided_slice %1 {offsets = [1, 0], sizes = [1, 10], strides = [1, 1]} : vector<2x10xf32> to vector<1x10xf32>
    %c0_3 = arith.constant 0 : index
    %c0_4 = arith.constant 0 : index
    %4 = vector.load %arg2[%c0_3, %c0_4] : memref<23x10xf32, #tpu.memory_space<vmem>>, vector<23x10xf32>
    %cst = arith.constant dense<0.000000e+00> : vector<40x10xf32>
    %5 = tpu.matmul %0, %4, %cst {dimension_numbers = #tpu.dot_dimension_numbers<[1], [0], [0], [1], [0, 0, 1, 1], [], []>} : vector<40x23xf32>, vector<23x10xf32>, vector<40x10xf32> -> vector<40x10xf32>
    %6 = vector.broadcast %2 : vector<1x10xf32> to vector<40x10xf32>
    %7 = arith.addf %5, %6 : vector<40x10xf32>
    %cst_5 = arith.constant 0.000000e+00 : f32
    %8 = vector.broadcast %cst_5 : f32 to vector<40x10xf32>
    %9 = arith.maximumf %7, %8 : vector<40x10xf32>
    %cst_6 = arith.constant dense<0.000000e+00> : vector<1x40xf32>
    %10 = tpu.matmul %3, %9, %cst_6 {dimension_numbers = #tpu.dot_dimension_numbers<[1], [1], [0], [0], [0, 0, 1, 0], [], []>} : vector<1x10xf32>, vector<40x10xf32>, vector<1x40xf32> -> vector<1x40xf32>
    %c0_7 = arith.constant 0 : index
    %c0_8 = arith.constant 0 : index
    %11 = memref.load %arg4[%c0_7, %c0_8] : memref<1x1xf32, #tpu.memory_space<smem>>
    %12 = vector.broadcast %11 : f32 to vector<1x40xf32>
    %13 = arith.addf %10, %12 : vector<1x40xf32>
    %cst_9 = arith.constant 0.000000e+00 : f32
    %14 = vector.broadcast %cst_9 : f32 to vector<1x40xf32>
    %15 = arith.subf %14, %13 : vector<1x40xf32>
    %16 = math.exp %15 : vector<1x40xf32>
    %cst_10 = arith.constant 1.000000e+00 : f32
    %17 = vector.broadcast %cst_10 : f32 to vector<1x40xf32>
    %18 = arith.addf %17, %16 : vector<1x40xf32>
    %cst_11 = arith.constant 1.000000e+00 : f32
    %19 = vector.broadcast %cst_11 : f32 to vector<1x40xf32>
    %20 = arith.divf %19, %18 : vector<1x40xf32>
    %c0_12 = arith.constant 0 : index
    %c0_13 = arith.constant 0 : index
    %21 = vector.load %arg5[%c0_12, %c0_13] : memref<1x40xf32, #tpu.memory_space<vmem>>, vector<1x40xf32>
    tpu.vector_store %arg5[%c0_12, %c0_13], %20 {strides = array<i32>} : memref<1x40xf32, #tpu.memory_space<vmem>>, vector<1x40xf32>,
    return
  }
  func.func @transform_0(%arg0: i32) -> (i32, i32) {
    %c0_i32 = arith.constant 0 : i32
    %c0_i32_0 = arith.constant 0 : i32
    return %arg0, %c0_i32 : i32, i32
  }
  func.func @transform_1(%arg0: i32) -> (i32, i32) {
    %c0_i32 = arith.constant 0 : i32
    %c0_i32_0 = arith.constant 0 : i32
    %c0_i32_1 = arith.constant 0 : i32
    return %c0_i32, %c0_i32_0 : i32, i32
  }
  func.func @transform_2(%arg0: i32) -> (i32, i32) {
    %c0_i32 = arith.constant 0 : i32
    %c0_i32_0 = arith.constant 0 : i32
    %c0_i32_1 = arith.constant 0 : i32
    return %c0_i32, %c0_i32_0 : i32, i32
  }
  func.func @transform_3(%arg0: i32) -> (i32, i32) {
    %c0_i32 = arith.constant 0 : i32
    %c0_i32_0 = arith.constant 0 : i32
    %c0_i32_1 = arith.constant 0 : i32
    return %c0_i32, %c0_i32_0 : i32, i32
  }
  func.func @transform_4(%arg0: i32) -> (i32, i32) {
    %c0_i32 = arith.constant 0 : i32
    %c0_i32_0 = arith.constant 0 : i32
    return %c0_i32, %arg0 : i32, i32
  }
}

</mosaic_0001>

<bundles_post_ra>
// kernel: tpu_custom_call.1
= control target key start
LH: loop header
LB: loop body
LE: loop exit
PB: predicated region body
PF: predicated region fallthrough
CT: control target
= control target key end

     0   :  { %v364_v2 = vmov 0.0|0.0   ;;  %vm365_vm0 = vmmov 0   ;;  %v366_v4 = vmov 0.0   ;;  %s445_s0 = inlined_call_operand.vmem [shape: f32[40,23], index: 0, kind: input, shape index: {}]   ;;  %s446_s1 = inlined_call_operand.vmem [shape: f32[23,10], index: 1, kind: input, shape index: {}]   ;;  %s447_s2 = inlined_call_operand.vmem [shape: f32[2,10], index: 2, kind: input, shape index: {}]   ;;  %s448_s3 = inlined_call_operand.<no memory space> [shape: f32[1,1], index: 3, kind: input, shape index: {}]   ;;  %s449_s4 = inlined_call_operand.hbm [shape: f32[1,40], index: 4, kind: output, shape index: {}]  }
   0x1   :  { %v25_v0 = vld [vmem:[%s446_s1] sm:$0xff]  ;;  %v26_v1 = vld [vmem:[%s446_s1 + $0x8] sm:$0xff]  ;;  %321 = vmatprep.subr.bf16.mxu0 %v364_v2  ;;  %324 = vmatprep.subr.bf16.mxu1 %v364_v2 }
   0x2   :  { %v322_v3 = vpack.c.bf16 %v26_v1, %v25_v0  ;;  %293 = vmatprep.mubr.msk.f32.mxu0 %vm365_vm0, %v366_v4  ;;  %318 = vmatprep.mubr.msk.f32.mxu1 %vm365_vm0, %v366_v4 }
   0x4   :  { %323 = vmatpush3.bf16.msra.mxu0 %v322_v3 }
   0x5   :  { %10 = vsyncpa [#allocation4], 0  ;;  %291 = vmatprep.subr.mxu0 %v366_v4  ;;  %v27_v5 = vld [vmem:[%s446_s1 + $0x10] sm:$0x7f]  ;;  %vm48_vm1 = vcmask 1046528   ;;  %v19_v6 = vld [vmem:[%s445_s0] sm:$0xff]  ;;  %v28_v11 = vlaneseq  ;;  %v148_v39 = vstv %s448_s3 }
   0x6   :  { %vm32_vm2 = vcmask 187392   ;;  %v20_v7 = vld [vmem:[%s445_s0 + $0x8] sm:$0xff]  ;;  %v21_v8 = vld [vmem:[%s445_s0 + $0x10] sm:$0xff]  ;;  %v22_v9 = vld [vmem:[%s445_s0 + $0x18] sm:$0xff]  ;;  %vm151_vm3 = vcmask 80896   ;;  %s367_s6 = smov [#allocation3]  }
   0x7   :  { %v23_v10 = vld [vmem:[%s445_s0 + $0x20] sm:$0xff]  ;;  %v29_v12 = vshrl.u32 %v28_v11, 7  ;;  %vm326_vm4 = vmpackc.low %vm151_vm3, %vm151_vm3  ;;  %s253_s7 = sshll.u32 %s367_s6, 4  ;;  %vm245_vm5 = vcmask 319488   ;;  %s254_s7 = int_to_ptr.vmem [resolvable:$true] %s253_s7 }
   0x8   :  { %292 = vmatpush3.msk.msra.mxu0 %vm48_vm1, %v27_v5  ;;  %v24_v14 = vld [vmem:[%s447_s2] sm:$0x3]  ;;  %s340_s8 = scalar_lea.vmem %s254_s7, 16  ;;  %s344_s9 = scalar_lea.vmem %s254_s7, 32 }
   0x9   :  { %294 = vmatmul.mubr.msk.f32.vlgmr.msra.gmra.mrb[0].mxu0 %vm32_vm2, %v19_v6  ;;  %v30_v13 = vsub.s32 0, %v29_v12  ;;  %v150_v38 = vrot.slane %v24_v14, 1  ;;  %p341_p0 = scmp.ne.s32.totalorder %s254_s7, %s340_s8  ;;  %p345_p1 = scmp.lt.s32.totalorder %s254_s7, %s254_s7 }
   0xa   :  { %296 = vmatprep.mubr.msk.f32.mxu0 %vm365_vm0, %v366_v4  ;;  %p346_p2 = scmp.lt.s32.totalorder %s344_s9, %s340_s8 }
   0xb   :  { %v31_v15 = vrot.slane %v24_v14, %v30_v13 }
   0xc   :  { %p347_p3 = por %p346_p2, %p345_p1 }
   0xd   :  { %297 = vmatmul.mubr.msk.f32.gmra.mrb[2].mxu0 %vm32_vm2, %v20_v7 }
   0xe   :  { %299 = vmatprep.mubr.msk.f32.mxu0 %vm365_vm0, %v366_v4  ;;  %p348_p4 = pnand %p347_p3, %p341_p0 }
  0x11   :  { %300 = vmatmul.mubr.msk.f32.gmra.mrb[4].mxu0 %vm32_vm2, %v21_v8 }
  0x12   :  { %302 = vmatprep.mubr.msk.f32.mxu0 %vm365_vm0, %v366_v4 }
  0x15   :  { %303 = vmatmul.mubr.msk.f32.gmra.mrb[6].mxu0 %vm32_vm2, %v22_v9 }
  0x16   :  { %305 = vmatprep.mubr.msk.f32.mxu0 %vm365_vm0, %v366_v4 }
  0x19   :  { %306 = vmatmul.mubr.msk.f32.gmra.mrb[8].mxu0 %vm32_vm2, %v23_v10 }
  0xdc   :  { %v118_v16 = vpop.f32.mrb[0].mxu0 }
  0xdd   :  { %v295_v17 = vpop.f32.mrb[1].mxu0  ;;  %v119_v18 = vadd.f32 %v118_v16, %v31_v15 }
  0xdf   :  { %v142_v22 = vmax.f32 %v119_v18, 0.0 }
  0xe0   :  { %v123_v19 = vpop.f32.mrb[2].mxu0 }
  0xe1   :  { %v124_v20 = vadd.f32 %v123_v19, %v31_v15  ;;  %v298_v21 = vpop.f32.mrb[3].mxu0 }
  0xe3   :  { %v143_v23 = vmax.f32 %v124_v20, 0.0 }
  0xe4   :  { %v128_v24 = vpop.f32.mrb[4].mxu0 }
  0xe5   :  { %v325_v25 = vpack.c.bf16 %v143_v23, %v142_v22  ;;  %v301_v26 = vpop.f32.mrb[5].mxu0  ;;  %v129_v27 = vadd.f32 %v128_v24, %v31_v15 }
  0xe7   :  { %327 = vmatpush3.bf16.xpose.msk.msra.mxu1 %vm326_vm4, %v325_v25  ;;  %v144_v31 = vmax.f32 %v129_v27, 0.0 }
  0xe8   :  { %v133_v28 = vpop.f32.mrb[6].mxu0  ;;  %328 = vmatprep.subr.bf16.mxu1 %v364_v2 }
  0xe9   :  { %v134_v29 = vadd.f32 %v133_v28, %v31_v15  ;;  %v304_v30 = vpop.f32.mrb[7].mxu0 }
  0xeb   :  { %v145_v32 = vmax.f32 %v134_v29, 0.0 }
  0xec   :  { %v138_v33 = vpop.f32.mrb[8].mxu0 }
  0xed   :  { %v329_v34 = vpack.c.bf16 %v145_v32, %v144_v31  ;;  %v307_v35 = vpop.f32.mrb[9].mxu0  ;;  %v139_v36 = vadd.f32 %v138_v33, %v31_v15 }
  0xef   :  { %331 = vmatpush3.bf16.xpose.msk.msra.mxu1 %vm326_vm4, %v329_v34  ;;  %v146_v37 = vmax.f32 %v139_v36, 0.0 }
  0xf0   :  { %316 = vmatprep.subr.mxu1 %v366_v4 }
  0xf7   :  { %317 = vmatpush3.xpose.msk.msra.mxu1 %vm151_vm3, %v146_v37 }
  0xfa   :  { %319 = vmatmul.mubr.msk.f32.vlgmr.msra.gmra.mrb[0].mxu1 %vm151_vm3, %v150_v38 }
 0x1cd   :  { %v235_v40 = vpop.f32.mrb[0].mxu1 }
 0x1ce   :  { %v236_v41 = vadd.f32 %v235_v40, %v148_v39  ;;  %v320_v42 = vpop.f32.mrb[1].mxu1 }
 0x1d0   :  { %v239_v43 = vsub.f32 0.0, %v236_v41 }
 0x1d2   :  { %v240_v44 = vmul.f32 1.442695, %v239_v43 }
 0x1d4   :  { %336 = vpow2.f32 %v240_v44 }
 0x1de   :  { %v337_v45 = vpop.eup %336 }
 0x1df   :  { %v242_v46 = vadd.f32 1.0, %v337_v45 }
 0x1e1   :  { %338 = vrcp.f32 %v242_v46 }
 0x1eb   :  { %v339_v47 = vpop.eup %338 }
 0x1ec   :  { %246 = vst.msk [vmem:[#allocation3] sm:$0x1] %vm245_vm5, %v339_v47 }
 0x1ed   :  { %351 = shalt.err (!%p348_p4)
}
 0x1ee   :  { %s352_s11 = scalar_lea.hbm %s449_s4, 16 }
 0x1ef   :  { %p353_p5 = scmp.ne.s32.totalorder %s449_s4, %s352_s11  ;;  %p356_p6 = scmp.lt.u32.totalorder %s352_s11, %s449_s4 }
 0x1f1   :  { %p358_p7 = pnand %p356_p6, %p353_p5 }
 0x1f3   :  { %361 = shalt.err (!%p358_p7)
}
 0x1f4   :  { %256 = dma.vmem_to_hbm [thread:$0]  %s254_s7, 16, %s449_s4, [#allocation4]  }
 0x1f5   :  { %362 = dma.done.wait [#allocation4], 16  }
 0x1f6   :  { %363 = vsyncadd [#allocation4], 4294967280 }
 0x1f7   :  { %260 = vsyncpa [#allocation4], 1 }

</bundles_post_ra>
